<compile_context>
chip_gen: v7x
topology: tpu7x:2x2x1
jax: 0.10.0
libtpu: 0.0.40
codegen_flags: <defaults>
</compile_context>

<pallas_src>
import functools

import jax
import jax.numpy as jnp
from jax.experimental import pallas as pl
from jax.experimental.pallas import tpu as pltpu

_LANE = 128
_NEG_INF = -1e30


def _round_up(n, m):
    return ((n + m - 1) // m) * m


def _mlp_logsoftmax_kernel(x_ref, w1_ref, b1_ref, w2_ref, b2_ref, out_ref):
    """Two MXU matmuls (f32 accumulation) + ReLU + numerically-stable log_softmax.

    Shapes (hidden / label dims lane-padded to multiples of 128):
      x: (TB, F)  w1: (F, Hp)  b1: (1, Hp) f32  w2: (Hp, Lp)  b2: (1, Lp) f32  out: (TB, Lp) f32

    Padded label lanes carry b2 = -1e30 (and zero w2 columns), so no in-kernel mask is
    needed before the logsumexp. Padded hidden lanes are exact zeros (zero w1 cols, zero
    b1 pad, zero w2 rows) and contribute nothing.
    """
    x = x_ref[...]
    h = jnp.dot(x, w1_ref[...], preferred_element_type=jnp.float32) + b1_ref[...]
    h = jnp.maximum(h, 0.0)                              # ReLU in f32
    h = h.astype(w2_ref.dtype)                           # down-cast only at the dot input

    logits = jnp.dot(h, w2_ref[...], preferred_element_type=jnp.float32) + b2_ref[...]

    # log_softmax(dim=-1) = logits - max - log(sum(exp(logits - max)))  (all f32)
    m = jnp.max(logits, axis=-1, keepdims=True)
    shifted = logits - m
    lse = jnp.log(jnp.sum(jnp.exp(shifted), axis=-1, keepdims=True))
    out_ref[...] = shifted - lse


def prepare_params(w1, b1, w2, b2, dtype=jnp.float32):
    """One-time parameter prep (hoisted out of the per-call hot path).

    - transposes torch-layout weights (out, in) -> (in, out) so the kernel computes x @ W
    - zero-pads hidden (100 -> 128) and label (8 -> 128) lane dims to full 128-lane tiles
    - bakes the class mask into b2: padded label lanes get -1e30 (w2 pad columns are 0)
    - weights in `dtype` (bf16 recommended at realistic batch sizes: native MXU datapath,
      half the weight DMA bytes); biases stay f32 so the bias add / mask / softmax run in
      the f32 accumulator space on every TPU generation.
    """
    H, F = w1.shape
    L = w2.shape[0]
    Hp = _round_up(H, _LANE)
    Lp = _round_up(L, _LANE)
    w1_t = jnp.zeros((F, Hp), dtype).at[:, :H].set(jnp.asarray(w1, dtype).T)
    b1_r = jnp.zeros((1, Hp), jnp.float32).at[:, :H].set(jnp.asarray(b1, jnp.float32))
    w2_t = jnp.zeros((Hp, Lp), dtype).at[:H, :L].set(jnp.asarray(w2, dtype).T)
    b2_r = jnp.full((1, Lp), _NEG_INF, jnp.float32).at[:, :L].set(
        jnp.asarray(b2, jnp.float32))
    return w1_t, b1_r, w2_t, b2_r


def neural_net_forward(x, w1_t, b1_r, w2_t, b2_r, *, block_b=256):
    """Forward pass. x: (B, F). Returns the lane-padded (B, Lp) f32 log-softmax.

    Columns >= label_num of the result contain ~-1e30 (padded classes); read only the
    first label_num lanes (or fuse the consumer). The slice is deliberately NOT done
    here so the hot path is a single Pallas dispatch with a lane-dense output store.
    """
    B, F = x.shape
    Lp = w2_t.shape[1]
    x = x.astype(w1_t.dtype)  # bf16 MXU feed + half the x DMA bytes when params are bf16

    if B % block_b != 0 or B < block_b:
        # Tiny / ragged batch: grid-less call, every operand is a full-array VMEM block.
        return pl.pallas_call(
            _mlp_logsoftmax_kernel,
            out_shape=jax.ShapeDtypeStruct((B, Lp), jnp.float32),
            in_specs=[pl.BlockSpec(memory_space=pltpu.MemorySpace.VMEM)] * 5,
            out_specs=pl.BlockSpec(memory_space=pltpu.MemorySpace.VMEM),
        )(x, w1_t, b1_r, w2_t, b2_r)

    # Batch-tiled path: weights/biases use constant index_maps (stay VMEM-resident, no
    # re-DMA per step); the batch axis is "parallel" so v7x's two TensorCores split it.
    # VMEM per step is tiny here (<1 MiB with TB=256), comfortably inside v7x's 64 MiB /
    # 32 MiB scoped default even with double-buffered x/out tiles.
    # TODO(synk): if a profile shows exposed DMA on the x tile, add
    #             pipeline_mode=pl.Buffered(3) to its BlockSpec.
    grid = (B // block_b,)
    return pl.pallas_call(
        _mlp_logsoftmax_kernel,
        out_shape=jax.ShapeDtypeStruct((B, Lp), jnp.float32),
        grid_spec=pltpu.PrefetchScalarGridSpec(
            num_scalar_prefetch=0,
            grid=grid,
            in_specs=[
                pl.BlockSpec((block_b, F), lambda i: (i, 0)),
                pl.BlockSpec(w1_t.shape, lambda i: (0, 0)),
                pl.BlockSpec(b1_r.shape, lambda i: (0, 0)),
                pl.BlockSpec(w2_t.shape, lambda i: (0, 0)),
                pl.BlockSpec(b2_r.shape, lambda i: (0, 0)),
            ],
            out_specs=pl.BlockSpec((block_b, Lp), lambda i: (i, 0)),
        ),
        compiler_params=pltpu.CompilerParams(
            dimension_semantics=("parallel",)),
    )(x, w1_t, b1_r, w2_t, b2_r)


def _init_params(key, total_embedding_size, label_num):
    # Deterministic init mimicking nn.Linear defaults: U(-1/sqrt(fan_in), 1/sqrt(fan_in)).
    hidden = 100
    k1, k2, k3, k4 = jax.random.split(key, 4)
    lim1 = 1.0 / jnp.sqrt(total_embedding_size)
    lim2 = 1.0 / jnp.sqrt(hidden)
    w1 = jax.random.uniform(k1, (hidden, total_embedding_size), jnp.float32, -lim1, lim1)
    b1 = jax.random.uniform(k2, (hidden,), jnp.float32, -lim1, lim1)
    w2 = jax.random.uniform(k3, (label_num, hidden), jnp.float32, -lim2, lim2)
    b2 = jax.random.uniform(k4, (label_num,), jnp.float32, -lim2, lim2)
    return w1, b1, w2, b2


if __name__ == "__main__":
    key = jax.random.PRNGKey(0)
    kx, kp, kxb = jax.random.split(key, 3)

    total_embedding_size = 32   # input feature size
    label_num = 8               # output classes
    w1, b1, w2, b2 = _init_params(kp, total_embedding_size, label_num)

    def reference(xs):
        h = jnp.maximum(xs @ w1.T + b1, 0.0)
        return jax.nn.log_softmax(h @ w2.T + b2, axis=-1)

    # --- small demo batch: grid-less path, f32 params for a tight numerical check ---
    batch = 2
    x = jax.random.normal(kx, (batch, total_embedding_size), jnp.float32)
    params_f32 = prepare_params(w1, b1, w2, b2, dtype=jnp.float32)
    fwd = jax.jit(neural_net_forward)
    out_pad = jax.block_until_ready(fwd(x, *params_f32))          # (2, 128) padded
    out = out_pad[:, :label_num]                                  # verification-only slice
    assert out.shape == (batch, label_num)
    assert jnp.allclose(out, reference(x), atol=1e-5), "f32 mismatch vs reference"

    # --- larger batch: tiled parallel-grid path with bf16 MXU feeds, f32 accumulation ---
    big_batch = 512
    xb = jax.random.normal(kxb, (big_batch, total_embedding_size), jnp.float32)
    params_bf16 = prepare_params(w1, b1, w2, b2, dtype=jnp.bfloat16)
    fwd_tiled = jax.jit(functools.partial(neural_net_forward, block_b=256))
    outb_pad = jax.block_until_ready(fwd_tiled(xb, *params_bf16))  # (512, 128) padded
    outb = outb_pad[:, :label_num]
    assert outb.shape == (big_batch, label_num)
    assert jnp.allclose(outb, reference(xb), atol=5e-2, rtol=5e-2), "bf16 mismatch vs reference"

    print("KERNEL_OK")
</pallas_src>

<mosaic_0001>
module attributes {stable_mosaic.version = 11 : i64} {
  func.func @_mlp_logsoftmax_kernel(%arg0: memref<2x32xf32, #tpu.memory_space<vmem>>, %arg1: memref<32x128xf32, #tpu.memory_space<vmem>>, %arg2: memref<1x128xf32, #tpu.memory_space<vmem>>, %arg3: memref<128x128xf32, #tpu.memory_space<vmem>>, %arg4: memref<1x128xf32, #tpu.memory_space<vmem>>, %arg5: memref<2x128xf32, #tpu.memory_space<vmem>>) attributes {dimension_semantics = [], scalar_prefetch = 0 : i64, scratch_operands = 0 : i64, tpu.core_type = #tpu.core_type<tc>} {
    %c0 = arith.constant 0 : index
    %c0_0 = arith.constant 0 : index
    %0 = vector.load %arg0[%c0, %c0_0] : memref<2x32xf32, #tpu.memory_space<vmem>>, vector<2x32xf32>
    %c0_1 = arith.constant 0 : index
    %c0_2 = arith.constant 0 : index
    %1 = vector.load %arg1[%c0_1, %c0_2] : memref<32x128xf32, #tpu.memory_space<vmem>>, vector<32x128xf32>
    %cst = arith.constant dense<0.000000e+00> : vector<2x128xf32>
    %2 = tpu.matmul %0, %1, %cst {dimension_numbers = #tpu.dot_dimension_numbers<[1], [0], [0], [1], [0, 0, 1, 1], [], []>} : vector<2x32xf32>, vector<32x128xf32>, vector<2x128xf32> -> vector<2x128xf32>
    %c0_3 = arith.constant 0 : index
    %c0_4 = arith.constant 0 : index
    %3 = vector.load %arg2[%c0_3, %c0_4] : memref<1x128xf32, #tpu.memory_space<vmem>>, vector<1x128xf32>
    %4 = vector.broadcast %3 : vector<1x128xf32> to vector<2x128xf32>
    %5 = arith.addf %2, %4 : vector<2x128xf32>
    %cst_5 = arith.constant 0.000000e+00 : f32
    %6 = vector.broadcast %cst_5 : f32 to vector<2x128xf32>
    %7 = arith.maximumf %5, %6 : vector<2x128xf32>
    %c0_6 = arith.constant 0 : index
    %c0_7 = arith.constant 0 : index
    %8 = vector.load %arg3[%c0_6, %c0_7] : memref<128x128xf32, #tpu.memory_space<vmem>>, vector<128x128xf32>
    %cst_8 = arith.constant dense<0.000000e+00> : vector<2x128xf32>
    %9 = tpu.matmul %7, %8, %cst_8 {dimension_numbers = #tpu.dot_dimension_numbers<[1], [0], [0], [1], [0, 0, 1, 1], [], []>} : vector<2x128xf32>, vector<128x128xf32>, vector<2x128xf32> -> vector<2x128xf32>
    %c0_9 = arith.constant 0 : index
    %c0_10 = arith.constant 0 : index
    %10 = vector.load %arg4[%c0_9, %c0_10] : memref<1x128xf32, #tpu.memory_space<vmem>>, vector<1x128xf32>
    %11 = vector.broadcast %10 : vector<1x128xf32> to vector<2x128xf32>
    %12 = arith.addf %9, %11 : vector<2x128xf32>
    %cst_11 = arith.constant dense<0xFF800000> : vector<2xf32>
    %13 = vector.multi_reduction <maximumf>, %12, %cst_11 [1] : vector<2x128xf32> to vector<2xf32>
    %14 = vector.shape_cast %13 : vector<2xf32> to vector<2x1xf32>
    %15 = vector.broadcast %14 : vector<2x1xf32> to vector<2x128xf32>
    %16 = arith.subf %12, %15 : vector<2x128xf32>
    %17 = math.exp %16 : vector<2x128xf32>
    %cst_12 = arith.constant dense<0.000000e+00> : vector<2xf32>
    %18 = vector.multi_reduction <add>, %17, %cst_12 [1] : vector<2x128xf32> to vector<2xf32>
    %19 = vector.shape_cast %18 : vector<2xf32> to vector<2x1xf32>
    %20 = math.log %19 : vector<2x1xf32>
    %21 = vector.broadcast %20 : vector<2x1xf32> to vector<2x128xf32>
    %22 = arith.subf %16, %21 : vector<2x128xf32>
    %c0_13 = arith.constant 0 : index
    %c0_14 = arith.constant 0 : index
    %23 = vector.load %arg5[%c0_13, %c0_14] : memref<2x128xf32, #tpu.memory_space<vmem>>, vector<2x128xf32>
    tpu.vector_store %arg5[%c0_13, %c0_14], %22 {strides = array<i32>} : memref<2x128xf32, #tpu.memory_space<vmem>>, vector<2x128xf32>,
    return
  }
}

</mosaic_0001>

<bundles_post_ra>
// kernel: neural_net_forward.1
= control target key start
LH: loop header
LB: loop body
LE: loop exit
PB: predicated region body
PF: predicated region fallthrough
CT: control target
= control target key end

     0   :  { %10 = vsyncpa [#allocation3], 0  ;;  %s577_s0 = inlined_call_operand.hbm [shape: f32[2,32], index: 0, kind: input, shape index: {}]   ;;  %s578_s1 = inlined_call_operand.hbm [shape: f32[32,128], index: 1, kind: input, shape index: {}]   ;;  %s579_s2 = inlined_call_operand.vmem [shape: f32[1,128], index: 2, kind: input, shape index: {}]   ;;  %s580_s3 = inlined_call_operand.hbm [shape: f32[128,128], index: 3, kind: input, shape index: {}]   ;;  %s581_s4 = inlined_call_operand.vmem [shape: f32[1,128], index: 4, kind: input, shape index: {}]   ;;  %s582_s5 = inlined_call_operand.hbm [shape: f32[2,128], index: 5, kind: output, shape index: {}]  }
   0x1   :  { %11 = vsyncpa [#allocation6], 0 }
   0x2   :  { %12 = vsyncpa [#allocation4], 0  ;;  %s478_s18 = smov [#allocation5]   ;;  %s384_s22 = scalar_lea.hbm %s578_s1, 512 }
   0x3   :  { %s28_s19 = sshll.u32 %s478_s18, 4  ;;  %p385_p0 = scmp.ne.s32.totalorder %s578_s1, %s384_s22  ;;  %s29_s19 = int_to_ptr.vmem [resolvable:$true] %s28_s19 }
   0x4   :  { %p388_p1 = scmp.lt.u32.totalorder %s384_s22, %s578_s1 }
   0x6   :  { %p390_p2 = pnand %p388_p1, %p385_p0 }
   0x8   :  { %393 = shalt.err (!%p390_p2)
}
   0x9   :  { %s394_s27 = scalar_lea.vmem %s29_s19, 512  ;;  %p399_p4 = scmp.lt.s32.totalorder %s29_s19, %s29_s19 }
   0xa   :  { %p395_p3 = scmp.ne.s32.totalorder %s29_s19, %s394_s27  ;;  %p400_p5 = scmp.lt.s32.totalorder %s394_s27, %s394_s27 }
   0xc   :  { %p401_p6 = por %p400_p5, %p399_p4 }
   0xe   :  { %p402_p7 = pnand %p401_p6, %p395_p3 }
  0x10   :  { %405 = shalt.err (!%p402_p7)
}
  0x11   :  { %s479_s28 = smov 128   ;;  %s480_s29 = smov 8  }
  0x12   :  { %34 = dma.hbm_to_vmem [thread:$0]  %s578_s1, 512, %s29_s19, [#allocation6], %s479_s28, %s479_s28, %s480_s29  }
  0x13   :  { %s481_s7 = smov [#allocation2]   ;;  %s482_s9 = smov [#allocation7]  }
  0x14   :  { %s19_s8 = sshll.u32 %s481_s7, 4  ;;  %s42_s10 = sshll.u32 %s482_s9, 4  ;;  %s20_s8 = int_to_ptr.vmem [resolvable:$true] %s19_s8  ;;  %s43_s10 = int_to_ptr.vmem [resolvable:$true] %s42_s10 }
  0x15   :  { %s406_s13 = scalar_lea.hbm %s577_s0, 32 }
  0x16   :  { %p407_p8 = scmp.ne.s32.totalorder %s577_s0, %s406_s13  ;;  %p410_p9 = scmp.lt.u32.totalorder %s406_s13, %s577_s0 }
  0x18   :  { %p412_p10 = pnand %p410_p9, %p407_p8 }
  0x1a   :  { %415 = shalt.err (!%p412_p10)
}
  0x1b   :  { %s416_s1 = scalar_lea.vmem %s20_s8, 32  ;;  %p421_p12 = scmp.lt.s32.totalorder %s20_s8, %s20_s8 }
  0x1c   :  { %p417_p11 = scmp.ne.s32.totalorder %s20_s8, %s416_s1  ;;  %p422_p13 = scmp.lt.s32.totalorder %s416_s1, %s416_s1 }
  0x1e   :  { %p423_p0 = por %p422_p13, %p421_p12 }
  0x20   :  { %p424_p1 = pnand %p423_p0, %p417_p11 }
  0x22   :  { %427 = shalt.err (!%p424_p1)
}
  0x23   :  { %22 = dma.hbm_to_vmem [thread:$0]  %s577_s0, 32, %s20_s8, [#allocation3]  }
  0x24   :  { %s428_s22 = scalar_lea.hbm %s580_s3, 2048 }
  0x25   :  { %p429_p2 = scmp.ne.s32.totalorder %s580_s3, %s428_s22  ;;  %p432_p3 = scmp.lt.u32.totalorder %s428_s22, %s580_s3 }
  0x27   :  { %p434_p4 = pnand %p432_p3, %p429_p2 }
  0x29   :  { %437 = shalt.err (!%p434_p4)
}
  0x2a   :  { %s438_s27 = scalar_lea.vmem %s43_s10, 2048  ;;  %p443_p6 = scmp.lt.s32.totalorder %s43_s10, %s43_s10 }
  0x2b   :  { %p439_p5 = scmp.ne.s32.totalorder %s43_s10, %s438_s27  ;;  %p444_p7 = scmp.lt.s32.totalorder %s438_s27, %s438_s27 }
  0x2d   :  { %p445_p8 = por %p444_p7, %p443_p6 }
  0x2f   :  { %p446_p9 = pnand %p445_p8, %p439_p5 }
  0x31   :  { %449 = shalt.err (!%p446_p9)
}
  0x32   :  { %48 = dma.hbm_to_vmem [thread:$0]  %s580_s3, 2048, %s43_s10, [#allocation6], %s479_s28, %s479_s28, %s480_s29  }
  0x33   :  { %472 = dma.done.wait [#allocation3], 32  }
  0x34   :  { %473 = vsyncadd [#allocation3], 4294967264 }
  0x35   :  { %474 = dma.done.wait [#allocation6], 2560  }
  0x36   :  { %475 = vsyncadd [#allocation6], 4294964736  ;;  %v483_v0 = vmov 0.0|0.0   ;;  %vm484_vm0 = vmmov 0   ;;  %v485_v1 = vmov 0.0   ;;  %v61_v2 = vld [vmem:[#allocation5] sm:$0xff] }
  0x37   :  { %341 = vmatprep.subr.bf16.mxu0 %v483_v0  ;;  %303 = vmatprep.mubr.msk.f32.mxu0 %vm484_vm0, %v485_v1  ;;  %v62_v3 = vld [vmem:[#allocation5 + $0x8] sm:$0xff]  ;;  %v63_v4 = vld [vmem:[#allocation5 + $0x10] sm:$0xff]  ;;  %v64_v6 = vld [vmem:[#allocation5 + $0x18] sm:$0xff]  ;;  %vm72_vm1 = vcmask 261120   ;;  %vm240_vm2 = vcmask 1041408  }
  0x38   :  { %347 = vmatprep.subr.bf16.mxu1 %v483_v0  ;;  %338 = vmatprep.mubr.msk.f32.mxu1 %vm484_vm0, %v485_v1  ;;  %v342_v5 = vpack.c.bf16 %v62_v3, %v61_v2  ;;  %v147_v7 = vld [vmem:[#allocation7] sm:$0xff]  ;;  %v148_v8 = vld [vmem:[#allocation7 + $0x8] sm:$0xff]  ;;  %v149_v9 = vld [vmem:[#allocation7 + $0x10] sm:$0xff]  ;;  %v345_v11 = vpack.c.bf16 %v64_v6, %v63_v4 }
  0x39   :  { %v150_v10 = vld [vmem:[#allocation7 + $0x18] sm:$0xff]  ;;  %v348_v12 = vpack.c.bf16 %v148_v8, %v147_v7  ;;  %v151_v14 = vld [vmem:[#allocation7 + $0x20] sm:$0xff]  ;;  %v152_v15 = vld [vmem:[#allocation7 + $0x28] sm:$0xff] }
  0x3a   :  { %343 = vmatpush3.bf16.msra.mxu0 %v342_v5  ;;  %v351_v13 = vpack.c.bf16 %v150_v10, %v149_v9  ;;  %v60_v16 = vld [vmem:[#allocation2] sm:$0x3]  ;;  %v354_v17 = vpack.c.bf16 %v152_v15, %v151_v14  ;;  %v153_v18 = vld [vmem:[#allocation7 + $0x30] sm:$0xff]  ;;  %v155_v21 = vld [vmem:[#allocation7 + $0x40] sm:$0xff] }
  0x3b   :  { %344 = vmatprep.subr.bf16.mxu0 %v483_v0  ;;  %349 = vmatpush3.bf16.msra.mxu1 %v348_v12  ;;  %v154_v19 = vld [vmem:[#allocation7 + $0x38] sm:$0xff]  ;;  %v156_v22 = vld [vmem:[#allocation7 + $0x48] sm:$0xff]  ;;  %v157_v24 = vld [vmem:[#allocation7 + $0x50] sm:$0xff] }
  0x3c   :  { %350 = vmatprep.subr.bf16.mxu1 %v483_v0  ;;  %v357_v20 = vpack.c.bf16 %v154_v19, %v153_v18  ;;  %v360_v23 = vpack.c.bf16 %v156_v22, %v155_v21  ;;  %v158_v25 = vld [vmem:[#allocation7 + $0x58] sm:$0xff]  ;;  %v159_v27 = vld [vmem:[#allocation7 + $0x60] sm:$0xff]  ;;  %v160_v28 = vld [vmem:[#allocation7 + $0x68] sm:$0xff] }
  0x3d   :  { %v363_v26 = vpack.c.bf16 %v158_v25, %v157_v24  ;;  %v366_v29 = vpack.c.bf16 %v160_v28, %v159_v27  ;;  %v161_v30 = vld [vmem:[#allocation7 + $0x70] sm:$0xff]  ;;  %v162_v31 = vld [vmem:[#allocation7 + $0x78] sm:$0xff] }
  0x3e   :  { %346 = vmatpush3.bf16.msra.mxu0 %v345_v11  ;;  %v369_v32 = vpack.c.bf16 %v162_v31, %v161_v30  ;;  %v270_v33 = vld [vmem:[%s579_s2] ss:$0 sm:$0xff]  ;;  %s486_s2 = smov [#allocation8]  }
  0x3f   :  { %352 = vmatpush3.bf16.msra.mxu1 %v351_v13  ;;  %v272_v38 = vld [vmem:[%s581_s4] ss:$0 sm:$0xff]  ;;  %s260_s7 = sshll.u32 %s486_s2, 4  ;;  %s261_s7 = int_to_ptr.vmem [resolvable:$true] %s260_s7 }
  0x40   :  { %353 = vmatprep.subr.bf16.mxu1 %v483_v0  ;;  %s450_s4 = scalar_lea.vmem %s261_s7, 32  ;;  %p455_p11 = scmp.lt.s32.totalorder %s261_s7, %s261_s7 }
  0x41   :  { %304 = vmatmul.mubr.msk.f32.vlgmr.msra.gmra.mrb[0].mxu0 %vm72_vm1, %v60_v16  ;;  %p451_p10 = scmp.ne.s32.totalorder %s261_s7, %s450_s4  ;;  %p456_p12 = scmp.lt.s32.totalorder %s450_s4, %s450_s4 }
  0x43   :  { %355 = vmatpush3.bf16.msra.mxu1 %v354_v17  ;;  %p457_p13 = por %p456_p12, %p455_p11 }
  0x44   :  { %356 = vmatprep.subr.bf16.mxu1 %v483_v0 }
  0x45   :  { %p458_p0 = pnand %p457_p13, %p451_p10 }
  0x47   :  { %358 = vmatpush3.bf16.msra.mxu1 %v357_v20 }
  0x48   :  { %359 = vmatprep.subr.bf16.mxu1 %v483_v0 }
  0x4b   :  { %361 = vmatpush3.bf16.msra.mxu1 %v360_v23 }
  0x4c   :  { %362 = vmatprep.subr.bf16.mxu1 %v483_v0 }
  0x4f   :  { %364 = vmatpush3.bf16.msra.mxu1 %v363_v26 }
  0x50   :  { %365 = vmatprep.subr.bf16.mxu1 %v483_v0 }
  0x53   :  { %367 = vmatpush3.bf16.msra.mxu1 %v366_v29 }
  0x54   :  { %368 = vmatprep.subr.bf16.mxu1 %v483_v0 }
  0x57   :  { %370 = vmatpush3.bf16.msra.mxu1 %v369_v32 }
 0x114   :  { %v142_v34 = vpop.f32.mrb[0].mxu0 }
 0x115   :  { %v143_v35 = vadd.f32 %v270_v33, %v142_v34  ;;  %v305_v36 = vpop.f32.mrb[1].mxu0 }
 0x117   :  { %v146_v37 = vmax.f32 %v143_v35, 0.0 }
 0x119   :  { %339 = vmatmul.mubr.f32.vlgmr.msra.gmra.mrb[0].mxu1 %v146_v37 }
 0x1ec   :  { %v236_v39 = vpop.f32.mrb[0].mxu1 }
 0x1ed   :  { %v237_v40 = vadd.f32 %v272_v38, %v236_v39  ;;  %v340_v41 = vpop.f32.mrb[1].mxu1 }
 0x1ef   :  { %v241_v42 = vsel %vm240_vm2, %v237_v40, -inf }
 0x1f0   :  { %242 = vmax.xlane.f32.xlu0 %v241_v42 }
 0x27d   :  { %v243_v43 = vpop.xlane.xlu0 %242 }
 0x27e   :  { %v244_v44 = vsub.f32 %v237_v40, %v243_v43 }
 0x280   :  { %v245_v45 = vmul.f32 1.442695, %v244_v44 }
 0x282   :  { %380 = vpow2.f32 %v245_v45 }
 0x28c   :  { %v381_v46 = vpop.eup %380 }
 0x28d   :  { %v247_v47 = vsel %vm240_vm2, %v381_v46, 0.0 }
 0x28e   :  { %248 = vadd.xlane.f32.xlu0 %v247_v47 }
 0x31b   :  { %v249_v48 = vpop.xlane.xlu0 %248 }
 0x31c   :  { %382 = vlog2.f32 %v249_v48 }
 0x326   :  { %v383_v49 = vpop.eup %382 }
 0x327   :  { %v251_v50 = vmul.f32 0.6931472, %v383_v49 }
 0x329   :  { %v252_v51 = vsub.f32 %v244_v44, %v251_v50 }
 0x32b   :  { %253 = vst [vmem:[#allocation8] sm:$0x3] %v252_v51 }
 0x32c   :  { %461 = shalt.err (!%p458_p0)
}
 0x32d   :  { %s462_s10 = scalar_lea.hbm %s582_s5, 32 }
 0x32e   :  { %p463_p1 = scmp.ne.s32.totalorder %s582_s5, %s462_s10  ;;  %p466_p2 = scmp.lt.u32.totalorder %s462_s10, %s582_s5 }
 0x330   :  { %p468_p3 = pnand %p466_p2, %p463_p1 }
 0x332   :  { %471 = shalt.err (!%p468_p3)
}
 0x333   :  { %263 = dma.vmem_to_hbm [thread:$0]  %s261_s7, 32, %s582_s5, [#allocation4]  }
 0x334   :  { %476 = dma.done.wait [#allocation4], 32  }
 0x335   :  { %477 = vsyncadd [#allocation4], 4294967264 }
 0x336   :  { %267 = vsyncpa [#allocation3], 1 }
 0x337   :  { %268 = vsyncpa [#allocation6], 1 }
 0x338   :  { %269 = vsyncpa [#allocation4], 1 }

</bundles_post_ra>
